<compile_context>
chip_gen: v6e
topology: v6e:2x2x1
jax: 0.10.0
libtpu: 0.0.40
codegen_flags: <defaults>
</compile_context>

<pallas_src>
import functools

import jax
import jax.numpy as jnp
from jax.experimental import pallas as pl
from jax.experimental.pallas import tpu as pltpu


def _pick_block(total, target, align):
    """Largest divisor of `total` that is a multiple of `align` and <= target, else `total`."""
    if total <= target:
        return total
    cand = (target // align) * align
    while cand >= align:
        if total % cand == 0:
            return cand
        cand -= align
    return total  # no aligned divisor -> single block along this axis (block == full dim)


def _contrastive_loss_kernel(emb_i_ref, emb_j_ref, lab_col_ref, lab_row_ref, out_ref,
                             scale_i_ref, neg_exp_ref, pos_sim_ref, cnt_ref,
                             *, inv_t, inv_two_b, mxu_dtype):
    j = pl.program_id(1)

    # ---- per-row-block init (runs once, at the first column block) -------------------
    @pl.when(j == 0)
    def _init():
        ei = emb_i_ref[...].astype(jnp.float32)                       # (tm, D)
        ssi = jnp.sum(ei * ei, axis=1, keepdims=True)                 # (tm, 1)
        # F.normalize(x, dim=1) == x * rsqrt(max(||x||^2, eps^2)); fold 1/T into the row scale.
        scale_i_ref[...] = jax.lax.rsqrt(jnp.maximum(ssi, 1e-24)) * inv_t
        neg_exp_ref[...] = jnp.zeros_like(neg_exp_ref)
        pos_sim_ref[...] = jnp.zeros_like(pos_sim_ref)
        cnt_ref[...] = jnp.zeros_like(cnt_ref)

    # ---- streamed column block --------------------------------------------------------
    ai = emb_i_ref[...]                                               # (tm, D) native dtype
    aj = emb_j_ref[...]                                               # (tn, D) native dtype
    if mxu_dtype is not None:                                         # optional (e.g. bf16 on v5e)
        ai = ai.astype(mxu_dtype)
        aj = aj.astype(mxu_dtype)

    # Raw (un-normalized) inner products: MXU, f32 accumulation, contraction on dim 1 of
    # both operands (no materialized transpose of emb_j).
    raw = jax.lax.dot_general(ai, aj, (((1,), (1,)), ((), ())),
                              preferred_element_type=jnp.float32)      # (tm, tn)

    # Column norms in ROW orientation via a tiny ones-matvec on the MXU (f32 accumulate).
    ej2 = jnp.square(emb_j_ref[...].astype(jnp.float32))              # (tn, D)
    ones = jnp.ones((8, ej2.shape[1]), jnp.float32)
    ssj_row = jax.lax.dot_general(ones, ej2, (((1,), (1,)), ((), ())),
                                  preferred_element_type=jnp.float32)[0:1, :]   # (1, tn)
    scale_j = jax.lax.rsqrt(jnp.maximum(ssj_row, 1e-24))              # (1, tn)

    # sim / T via rank-1 post-scaling (row scale already carries 1/T).
    sim_t = raw * scale_i_ref[...] * scale_j                          # (tm, tn)
    exp_sim = jnp.exp(sim_t)

    match = lab_col_ref[...] == lab_row_ref[...]                      # (tm,1)==(1,tn) -> (tm,tn)

    neg_exp_ref[...] += jnp.sum(jnp.where(match, 0.0, exp_sim), axis=1, keepdims=True)
    pos_sim_ref[...] += jnp.sum(jnp.where(match, sim_t, 0.0), axis=1, keepdims=True)
    cnt_ref[...] += jnp.sum(match.astype(jnp.float32), axis=1, keepdims=True)

    # ---- finalize per-row partial losses ----------------------------------------------
    @pl.when(j == pl.num_programs(1) - 1)
    def _finalize():
        denom = neg_exp_ref[...]                                      # (tm, 1)
        out_ref[...] = (cnt_ref[...] * jnp.log(denom) - pos_sim_ref[...]) * inv_two_b


def object_level_contrastive_loss(emb_i, emb_j, labels, temperature=0.5, mxu_dtype=None):
    """emb_i, emb_j: (B, D) float (any dtype); labels: (B,) int. Returns scalar f32 loss.

    mxu_dtype: optional override for the MXU operand dtype (e.g. jnp.bfloat16 on v5e when
    the inputs are f32). Default None = feed the native input dtype (tightest numerics on
    v6e/v7x, no operand round-trips when the inputs are already bf16).
    """
    B, D = emb_i.shape
    lab_col = labels.reshape(B, 1).astype(jnp.int32)   # row-side labels, tiled (tm, 1)
    lab_row = labels.reshape(1, B).astype(jnp.int32)   # column-side labels, tiled (1, tn)

    # Block sizing: budget the double-buffered streamed emb_j block to ~8 MiB and the
    # resident emb_i block to ~4 MiB, capped at 512 / 256 rows (fits v7x's 64 MiB VMEM
    # with plenty of headroom under the 48 MiB scoped limit below).
    itemsize = jnp.dtype(emb_i.dtype).itemsize
    tn_target = max(128, min(512, (8 * 1024 * 1024) // (2 * D * itemsize)))
    tm_target = max(8, min(256, (4 * 1024 * 1024) // (2 * D * itemsize)))
    tm = _pick_block(B, tm_target, 8)      # sublane-aligned (or == B)
    tn = _pick_block(B, tn_target, 128)    # lane-aligned (or == B)
    grid = (B // tm, B // tn)

    kernel = functools.partial(
        _contrastive_loss_kernel,
        inv_t=1.0 / float(temperature),
        inv_two_b=1.0 / (2.0 * B),
        mxu_dtype=mxu_dtype)

    row_losses = pl.pallas_call(
        kernel,
        out_shape=jax.ShapeDtypeStruct((B, 1), jnp.float32),
        grid_spec=pltpu.PrefetchScalarGridSpec(
            num_scalar_prefetch=0,
            grid=grid,
            in_specs=[
                pl.BlockSpec((tm, D), lambda i, j: (i, 0)),   # emb_i: resident per row block
                pl.BlockSpec((tn, D), lambda i, j: (j, 0)),   # emb_j: streamed / double-buffered
                pl.BlockSpec((tm, 1), lambda i, j: (i, 0)),   # row-side labels
                pl.BlockSpec((1, tn), lambda i, j: (0, j)),   # column-side labels
            ],
            out_specs=pl.BlockSpec((tm, 1), lambda i, j: (i, 0)),
            scratch_shapes=[
                pltpu.VMEM((tm, 1), jnp.float32),   # row scale (rsqrt(||emb_i||^2) / T)
                pltpu.VMEM((tm, 1), jnp.float32),   # sum over negatives of exp(sim/T)
                pltpu.VMEM((tm, 1), jnp.float32),   # sum over positives of sim/T
                pltpu.VMEM((tm, 1), jnp.float32),   # positive count per row
            ],
        ),
        compiler_params=pltpu.CompilerParams(
            dimension_semantics=("parallel", "arbitrary"),
            vmem_limit_bytes=48 * 1024 * 1024),
    )(emb_i, emb_j, lab_col, lab_row)

    return jnp.sum(row_losses)


def _reference_loss(emb_i, emb_j, labels, temperature=0.5, eps=1e-12):
    """Pure-JAX f32 transcription of the PyTorch forward (for validation)."""
    def norm(x):
        n = jnp.sqrt(jnp.sum(x * x, axis=1, keepdims=True))
        return x / jnp.maximum(n, eps)
    zi, zj = norm(emb_i), norm(emb_j)
    sim = zi @ zj.T
    match = labels[None, :] == labels[:, None]
    pos = match.astype(jnp.float32)
    neg = 1.0 - pos
    nominator = jnp.exp(sim * pos / temperature)
    denom = jnp.sum(neg * jnp.exp(sim / temperature), axis=1)   # (B,)
    lp = -jnp.log(nominator / denom[None, :])                   # torch broadcast: denom over columns
    lp = jnp.where(match, lp, 0.0)
    return jnp.sum(lp) / (2 * emb_i.shape[0])


if __name__ == "__main__":
    B, D = 8, 32
    temperature = 0.5  # deterministic buffer value from __init__

    key = jax.random.PRNGKey(0)
    k1, k2 = jax.random.split(key)
    emb_i = jax.random.normal(k1, (B, D), dtype=jnp.float32)
    emb_j = jax.random.normal(k2, (B, D), dtype=jnp.float32)
    labels = jnp.array([0, 0, 1, 1, 2, 2, 3, 3], dtype=jnp.int32)

    loss = jax.block_until_ready(object_level_contrastive_loss(emb_i, emb_j, labels, temperature))
    ref = jax.block_until_ready(_reference_loss(emb_i, emb_j, labels, temperature))

    # f32 MXU operands + f32 accumulation: only accumulation-order / rsqrt-level differences.
    assert jnp.allclose(loss, ref, rtol=1e-2, atol=1e-2), (loss, ref)

    print("KERNEL_OK")
</pallas_src>

<mosaic_0001>
module attributes {stable_mosaic.version = 11 : i64} {
  func.func @_contrastive_loss_kernel(%arg0: i32, %arg1: i32, %arg2: memref<8x32xf32, #tpu.memory_space<vmem>>, %arg3: memref<8x32xf32, #tpu.memory_space<vmem>>, %arg4: memref<8x1xi32, #tpu.memory_space<vmem>>, %arg5: memref<1x8xi32, #tpu.memory_space<vmem>>, %arg6: memref<8x1xf32, #tpu.memory_space<vmem>>, %arg7: memref<8x1xf32, #tpu.memory_space<vmem>>, %arg8: memref<8x1xf32, #tpu.memory_space<vmem>>, %arg9: memref<8x1xf32, #tpu.memory_space<vmem>>, %arg10: memref<8x1xf32, #tpu.memory_space<vmem>>) attributes {dimension_semantics = [#tpu.dimension_semantics<parallel>, #tpu.dimension_semantics<arbitrary>], iteration_bounds = array<i64: 1, 1>, scalar_prefetch = 0 : i64, scratch_operands = 4 : i64, tpu.core_type = #tpu.core_type<tc>, window_params = [{transform_indices = @transform_0, window_bounds = array<i64: 8, 32>}, {transform_indices = @transform_1, window_bounds = array<i64: 8, 32>}, {transform_indices = @transform_2, window_bounds = array<i64: 8, 1>}, {transform_indices = @transform_3, window_bounds = array<i64: 1, 8>}, {transform_indices = @transform_4, window_bounds = array<i64: 8, 1>}]} {
    %c0_i32 = arith.constant 0 : i32
    %0 = arith.cmpi eq, %arg1, %c0_i32 : i32
    %1 = arith.extui %0 : i1 to i32
    %c0_i32_0 = arith.constant 0 : i32
    %2 = arith.cmpi ne, %1, %c0_i32_0 : i32
    scf.if %2 {
      %c0_34 = arith.constant 0 : index
      %c0_35 = arith.constant 0 : index
      %49 = vector.load %arg2[%c0_34, %c0_35] : memref<8x32xf32, #tpu.memory_space<vmem>>, vector<8x32xf32>
      %50 = arith.mulf %49, %49 : vector<8x32xf32>
      %cst_36 = arith.constant dense<0.000000e+00> : vector<8xf32>
      %51 = vector.multi_reduction <add>, %50, %cst_36 [1] : vector<8x32xf32> to vector<8xf32>
      %52 = vector.shape_cast %51 : vector<8xf32> to vector<8x1xf32>
      %cst_37 = arith.constant 1.000000e-24 : f32
      %53 = vector.broadcast %cst_37 : f32 to vector<8x1xf32>
      %54 = arith.maximumf %52, %53 : vector<8x1xf32>
      %55 = math.rsqrt %54 : vector<8x1xf32>
      %cst_38 = arith.constant 2.000000e+00 : f32
      %56 = vector.broadcast %cst_38 : f32 to vector<8x1xf32>
      %57 = arith.mulf %55, %56 : vector<8x1xf32>
      %c0_39 = arith.constant 0 : index
      %c0_40 = arith.constant 0 : index
      %58 = vector.load %arg7[%c0_39, %c0_40] : memref<8x1xf32, #tpu.memory_space<vmem>>, vector<8x1xf32>
      tpu.vector_store %arg7[%c0_39, %c0_40], %57 {strides = array<i32>} : memref<8x1xf32, #tpu.memory_space<vmem>>, vector<8x1xf32>,
      %cst_41 = arith.constant 0.000000e+00 : f32
      %59 = vector.broadcast %cst_41 : f32 to vector<8x1xf32>
      %c0_42 = arith.constant 0 : index
      %c0_43 = arith.constant 0 : index
      %60 = vector.load %arg8[%c0_42, %c0_43] : memref<8x1xf32, #tpu.memory_space<vmem>>, vector<8x1xf32>
      tpu.vector_store %arg8[%c0_42, %c0_43], %59 {strides = array<i32>} : memref<8x1xf32, #tpu.memory_space<vmem>>, vector<8x1xf32>,
      %cst_44 = arith.constant 0.000000e+00 : f32
      %61 = vector.broadcast %cst_44 : f32 to vector<8x1xf32>
      %c0_45 = arith.constant 0 : index
      %c0_46 = arith.constant 0 : index
      %62 = vector.load %arg9[%c0_45, %c0_46] : memref<8x1xf32, #tpu.memory_space<vmem>>, vector<8x1xf32>
      tpu.vector_store %arg9[%c0_45, %c0_46], %61 {strides = array<i32>} : memref<8x1xf32, #tpu.memory_space<vmem>>, vector<8x1xf32>,
      %cst_47 = arith.constant 0.000000e+00 : f32
      %63 = vector.broadcast %cst_47 : f32 to vector<8x1xf32>
      %c0_48 = arith.constant 0 : index
      %c0_49 = arith.constant 0 : index
      %64 = vector.load %arg10[%c0_48, %c0_49] : memref<8x1xf32, #tpu.memory_space<vmem>>, vector<8x1xf32>
      tpu.vector_store %arg10[%c0_48, %c0_49], %63 {strides = array<i32>} : memref<8x1xf32, #tpu.memory_space<vmem>>, vector<8x1xf32>,
    } else {
    }
    %c0 = arith.constant 0 : index
    %c0_1 = arith.constant 0 : index
    %3 = vector.load %arg2[%c0, %c0_1] : memref<8x32xf32, #tpu.memory_space<vmem>>, vector<8x32xf32>
    %c0_2 = arith.constant 0 : index
    %c0_3 = arith.constant 0 : index
    %4 = vector.load %arg3[%c0_2, %c0_3] : memref<8x32xf32, #tpu.memory_space<vmem>>, vector<8x32xf32>
    %cst = arith.constant dense<0.000000e+00> : vector<8x8xf32>
    %5 = tpu.matmul %3, %4, %cst {dimension_numbers = #tpu.dot_dimension_numbers<[1], [1], [0], [0], [0, 0, 1, 0], [], []>} : vector<8x32xf32>, vector<8x32xf32>, vector<8x8xf32> -> vector<8x8xf32>
    %c0_4 = arith.constant 0 : index
    %c0_5 = arith.constant 0 : index
    %6 = vector.load %arg3[%c0_4, %c0_5] : memref<8x32xf32, #tpu.memory_space<vmem>>, vector<8x32xf32>
    %7 = arith.mulf %6, %6 : vector<8x32xf32>
    %cst_6 = arith.constant 1.000000e+00 : f32
    %8 = vector.broadcast %cst_6 : f32 to vector<8x32xf32>
    %cst_7 = arith.constant dense<0.000000e+00> : vector<8x8xf32>
    %9 = tpu.matmul %8, %7, %cst_7 {dimension_numbers = #tpu.dot_dimension_numbers<[1], [1], [0], [0], [0, 0, 1, 0], [], []>} : vector<8x32xf32>, vector<8x32xf32>, vector<8x8xf32> -> vector<8x8xf32>
    %10 = vector.extract_strided_slice %9 {offsets = [0, 0], sizes = [1, 8], strides = [1, 1]} : vector<8x8xf32> to vector<1x8xf32>
    %cst_8 = arith.constant 1.000000e-24 : f32
    %11 = vector.broadcast %cst_8 : f32 to vector<1x8xf32>
    %12 = arith.maximumf %10, %11 : vector<1x8xf32>
    %13 = math.rsqrt %12 : vector<1x8xf32>
    %c0_9 = arith.constant 0 : index
    %c0_10 = arith.constant 0 : index
    %14 = vector.load %arg7[%c0_9, %c0_10] : memref<8x1xf32, #tpu.memory_space<vmem>>, vector<8x1xf32>
    %15 = vector.broadcast %14 : vector<8x1xf32> to vector<8x8xf32>
    %16 = arith.mulf %5, %15 : vector<8x8xf32>
    %17 = vector.broadcast %13 : vector<1x8xf32> to vector<8x8xf32>
    %18 = arith.mulf %16, %17 : vector<8x8xf32>
    %19 = math.exp %18 : vector<8x8xf32>
    %c0_11 = arith.constant 0 : index
    %c0_12 = arith.constant 0 : index
    %20 = vector.load %arg4[%c0_11, %c0_12] : memref<8x1xi32, #tpu.memory_space<vmem>>, vector<8x1xi32>
    %c0_13 = arith.constant 0 : index
    %c0_14 = arith.constant 0 : index
    %21 = vector.load %arg5[%c0_13, %c0_14] : memref<1x8xi32, #tpu.memory_space<vmem>>, vector<1x8xi32>
    %22 = vector.broadcast %20 : vector<8x1xi32> to vector<8x8xi32>
    %23 = vector.broadcast %21 : vector<1x8xi32> to vector<8x8xi32>
    %24 = arith.cmpi eq, %22, %23 : vector<8x8xi32>
    %c0_15 = arith.constant 0 : index
    %c0_16 = arith.constant 0 : index
    %25 = vector.load %arg8[%c0_15, %c0_16] : memref<8x1xf32, #tpu.memory_space<vmem>>, vector<8x1xf32>
    %cst_17 = arith.constant 0.000000e+00 : f32
    %26 = vector.broadcast %cst_17 : f32 to vector<8x8xf32>
    %27 = arith.select %24, %26, %19 : vector<8x8xi1>, vector<8x8xf32>
    %cst_18 = arith.constant dense<0.000000e+00> : vector<8xf32>
    %28 = vector.multi_reduction <add>, %27, %cst_18 [1] : vector<8x8xf32> to vector<8xf32>
    %29 = vector.shape_cast %28 : vector<8xf32> to vector<8x1xf32>
    %30 = arith.addf %25, %29 : vector<8x1xf32>
    %c0_19 = arith.constant 0 : index
    %c0_20 = arith.constant 0 : index
    %31 = vector.load %arg8[%c0_19, %c0_20] : memref<8x1xf32, #tpu.memory_space<vmem>>, vector<8x1xf32>
    tpu.vector_store %arg8[%c0_19, %c0_20], %30 {strides = array<i32>} : memref<8x1xf32, #tpu.memory_space<vmem>>, vector<8x1xf32>,
    %c0_21 = arith.constant 0 : index
    %c0_22 = arith.constant 0 : index
    %32 = vector.load %arg9[%c0_21, %c0_22] : memref<8x1xf32, #tpu.memory_space<vmem>>, vector<8x1xf32>
    %cst_23 = arith.constant 0.000000e+00 : f32
    %33 = vector.broadcast %cst_23 : f32 to vector<8x8xf32>
    %34 = arith.select %24, %18, %33 : vector<8x8xi1>, vector<8x8xf32>
    %cst_24 = arith.constant dense<0.000000e+00> : vector<8xf32>
    %35 = vector.multi_reduction <add>, %34, %cst_24 [1] : vector<8x8xf32> to vector<8xf32>
    %36 = vector.shape_cast %35 : vector<8xf32> to vector<8x1xf32>
    %37 = arith.addf %32, %36 : vector<8x1xf32>
    %c0_25 = arith.constant 0 : index
    %c0_26 = arith.constant 0 : index
    %38 = vector.load %arg9[%c0_25, %c0_26] : memref<8x1xf32, #tpu.memory_space<vmem>>, vector<8x1xf32>
    tpu.vector_store %arg9[%c0_25, %c0_26], %37 {strides = array<i32>} : memref<8x1xf32, #tpu.memory_space<vmem>>, vector<8x1xf32>,
    %c0_27 = arith.constant 0 : index
    %c0_28 = arith.constant 0 : index
    %39 = vector.load %arg10[%c0_27, %c0_28] : memref<8x1xf32, #tpu.memory_space<vmem>>, vector<8x1xf32>
    %40 = arith.extui %24 : vector<8x8xi1> to vector<8x8xi32>
    %41 = arith.sitofp %40 : vector<8x8xi32> to vector<8x8xf32>
    %cst_29 = arith.constant dense<0.000000e+00> : vector<8xf32>
    %42 = vector.multi_reduction <add>, %41, %cst_29 [1] : vector<8x8xf32> to vector<8xf32>
    %43 = vector.shape_cast %42 : vector<8xf32> to vector<8x1xf32>
    %44 = arith.addf %39, %43 : vector<8x1xf32>
    %c0_30 = arith.constant 0 : index
    %c0_31 = arith.constant 0 : index
    %45 = vector.load %arg10[%c0_30, %c0_31] : memref<8x1xf32, #tpu.memory_space<vmem>>, vector<8x1xf32>
    tpu.vector_store %arg10[%c0_30, %c0_31], %44 {strides = array<i32>} : memref<8x1xf32, #tpu.memory_space<vmem>>, vector<8x1xf32>,
    %c0_i32_32 = arith.constant 0 : i32
    %46 = arith.cmpi eq, %arg1, %c0_i32_32 : i32
    %47 = arith.extui %46 : i1 to i32
    %c0_i32_33 = arith.constant 0 : i32
    %48 = arith.cmpi ne, %47, %c0_i32_33 : i32
    scf.if %48 {
      %c0_34 = arith.constant 0 : index
      %c0_35 = arith.constant 0 : index
      %49 = vector.load %arg8[%c0_34, %c0_35] : memref<8x1xf32, #tpu.memory_space<vmem>>, vector<8x1xf32>
      %c0_36 = arith.constant 0 : index
      %c0_37 = arith.constant 0 : index
      %50 = vector.load %arg10[%c0_36, %c0_37] : memref<8x1xf32, #tpu.memory_space<vmem>>, vector<8x1xf32>
      %51 = math.log %49 : vector<8x1xf32>
      %52 = arith.mulf %50, %51 : vector<8x1xf32>
      %c0_38 = arith.constant 0 : index
      %c0_39 = arith.constant 0 : index
      %53 = vector.load %arg9[%c0_38, %c0_39] : memref<8x1xf32, #tpu.memory_space<vmem>>, vector<8x1xf32>
      %54 = arith.subf %52, %53 : vector<8x1xf32>
      %cst_40 = arith.constant 6.250000e-02 : f32
      %55 = vector.broadcast %cst_40 : f32 to vector<8x1xf32>
      %56 = arith.mulf %54, %55 : vector<8x1xf32>
      %c0_41 = arith.constant 0 : index
      %c0_42 = arith.constant 0 : index
      %57 = vector.load %arg6[%c0_41, %c0_42] : memref<8x1xf32, #tpu.memory_space<vmem>>, vector<8x1xf32>
      tpu.vector_store %arg6[%c0_41, %c0_42], %56 {strides = array<i32>} : memref<8x1xf32, #tpu.memory_space<vmem>>, vector<8x1xf32>,
    } else {
    }
    return
  }
  func.func @transform_0(%arg0: i32, %arg1: i32) -> (i32, i32) {
    %c0_i32 = arith.constant 0 : i32
    %c0_i32_0 = arith.constant 0 : i32
    return %arg0, %c0_i32 : i32, i32
  }
  func.func @transform_1(%arg0: i32, %arg1: i32) -> (i32, i32) {
    %c0_i32 = arith.constant 0 : i32
    %c0_i32_0 = arith.constant 0 : i32
    return %arg1, %c0_i32 : i32, i32
  }
  func.func @transform_2(%arg0: i32, %arg1: i32) -> (i32, i32) {
    %c0_i32 = arith.constant 0 : i32
    %c0_i32_0 = arith.constant 0 : i32
    return %arg0, %c0_i32 : i32, i32
  }
  func.func @transform_3(%arg0: i32, %arg1: i32) -> (i32, i32) {
    %c0_i32 = arith.constant 0 : i32
    %c0_i32_0 = arith.constant 0 : i32
    return %c0_i32, %arg1 : i32, i32
  }
  func.func @transform_4(%arg0: i32, %arg1: i32) -> (i32, i32) {
    %c0_i32 = arith.constant 0 : i32
    %c0_i32_0 = arith.constant 0 : i32
    return %arg0, %c0_i32 : i32, i32
  }
}

</mosaic_0001>

<bundles_post_ra>
// kernel: tpu_custom_call.1
= control target key start
LH: loop header
LB: loop body
LE: loop exit
PB: predicated region body
PF: predicated region fallthrough
CT: control target
= control target key end

     0   :  { %9 = vsyncpa [#allocation7], 0  ;;  %s327_s15 = smov [#allocation6]   ;;  %s380_s0 = inlined_call_operand.vmem [shape: f32[8,32], index: 0, kind: input, shape index: {}]   ;;  %s381_s1 = inlined_call_operand.hbm [shape: f32[8,32], index: 1, kind: input, shape index: {}]   ;;  %s382_s2 = inlined_call_operand.vmem [shape: s32[8,1], index: 2, kind: input, shape index: {}]   ;;  %s383_s3 = inlined_call_operand.vmem [shape: s32[1,8], index: 3, kind: input, shape index: {}]   ;;  %s384_s4 = inlined_call_operand.vmem [shape: f32[8,1], index: 4, kind: output, shape index: {}]  }
   0x1   :  { %s18_s16 = sshll.u32 %s327_s15, 4  ;;  %s19_s16 = int_to_ptr.vmem [resolvable:$true] %s18_s16 }
   0x2   :  { %s313_s17 = scalar_lea.vmem %s19_s16, 128  ;;  %p318_p1 = scmp.lt.s32.totalorder %s19_s16, %s19_s16 }
   0x3   :  { %p314_p0 = scmp.ne.s32.totalorder %s19_s16, %s313_s17  ;;  %p319_p2 = scmp.lt.s32.totalorder %s313_s17, %s313_s17 }
   0x5   :  { %p320_p3 = por %p319_p2, %p318_p1 }
   0x7   :  { %p321_p4 = pnand %p320_p3, %p314_p0 }
   0x9   :  { %324 = shalt.err (!%p321_p4)
}
   0xa   :  { %21 = dma.hbm_to_vmem [thread:$0]  %s381_s1, 128, %s19_s16, [#allocation7]  }
   0xb   :  { %325 = dma.done.wait [#allocation7], 128  }
   0xc   :  { %326 = vsyncadd [#allocation7], 4294967168  ;;  %v328_v0 = vmov 0.0   ;;  %vm329_vm0 = vmmov 0   ;;  %vm42_vm1 = vcmask 7168   ;;  %v33_v1 = vld [vmem:[%s380_s0] sm:$0xff]  ;;  %v212_v19 = vlaneseq }
   0xd   :  { %285 = vmatprep.subr.mxu1 %v328_v0  ;;  %287 = vmatprep.mubr.msk.f32.mxu1 %vm329_vm0, %v328_v0  ;;  %44 = vst.msk [vmem:[#allocation3] sm:$0xff] %vm42_vm1, %v328_v0  ;;  %45 = vst.msk [vmem:[#allocation4] sm:$0xff] %vm42_vm1, %v328_v0  ;;  %vm35_vm2 = vcmask 261120   ;;  %v48_v2 = vld [vmem:[#allocation6] sm:$0xff]  ;;  %v34_v3 = vmul.f32 %v33_v1, %v33_v1  ;;  %v330_v6 = vmov 1.0   ;;  %v331_v7 = vmov 0  }
   0xe   :  { %280 = vmatprep.subr.mxu0 %v328_v0  ;;  %282 = vmatprep.mubr.msk.f32.mxu0 %vm329_vm0, %v328_v0  ;;  %46 = vst.msk [vmem:[#allocation5] sm:$0xff] %vm42_vm1, %v328_v0  ;;  %v126_v4 = vmul.f32 %v48_v2, %v48_v2  ;;  %v219_v8 = vld [vmem:[%s382_s2] sm:$0xff]  ;;  %v213_v20 = vshrl.u32 %v212_v19, 7  ;;  %vm231_vm4 = vcmask 64512  }
   0xf   :  { %281 = vmatpush3.xpose.msk.msra.mxu0 %vm35_vm2, %v48_v2  ;;  %v36_v5 = vsel %vm35_vm2, %v34_v3, 0.0  ;;  %295 = vset.pattern.permute.xlu0 %v331_v7  ;;  %v274_v28 = vld [vmem:[%s383_s3] ss:$0 sm:$0xff] }
  0x10   :  { %286 = vmatpush3.xpose.msk.msra.mxu1 %vm35_vm2, %v126_v4  ;;  %37 = vadd.xlane.f32.xlu0 %v36_v5  ;;  %v214_v21 = vsub.s32 0, %v213_v20 }
  0x11   :  { %296 = vset.pattern.permute.xlu1 %v331_v7 }
  0x12   :  { %283 = vmatmul.mubr.msk.f32.vlgmr.msra.gmra.mxu0 %vm35_vm2, %v33_v1  ;;  %222 = vperm.xlu1 %296, %v219_v8  }
  0x13   :  { %288 = vmatmul.mubr.msk.f32.vlgmr.msra.gmra.mxu1 %vm35_vm2, %v330_v6 }
  0x14   :  { %v229_v37 = vld [vmem:[#allocation3] sm:$0xff]  ;;  %v238_v43 = vld [vmem:[#allocation4] sm:$0xff] }
  0x15   :  { %v245_v40 = vld [vmem:[#allocation5] sm:$0xff] }
  0x8d   :  { %v223_v29 = vpop.permute.xlu1 %222 }
  0x8e   :  { %vm228_vm3 = vcmp.eq.s32.totalorder %v223_v29, %v274_v28 }
  0x8f   :  { %v275_v33 = vsel %vm228_vm3, 1.0, %v328_v0 }
  0x90   :  { %v248_v34 = vsel %vm231_vm4, %v275_v33, 0.0 }
  0x99   :  { %v38_v9 = vpop.xlane.xlu0 %37 }
  0x9a   :  { %v39_v10 = vmax.f32 %v38_v9, 1e-24 }
  0x9c   :  { %297 = vrsqrt.f32 %v39_v10 }
  0xa9   :  { %v298_v11 = vpop.eup %297 }
  0xaa   :  { %v41_v12 = vmul.f32 2.0, %v298_v11 }
  0xac   :  { %43 = vst.msk [vmem:[#allocation2] sm:$0xff] %vm42_vm1, %v41_v12 }
  0xb3   :  { %v205_v13 = vld [vmem:[#allocation2] sm:$0xff] }
  0xb4   :  { %208 = vperm.xlu0 %295, %v205_v13  }
  0xd2   :  { %v122_v14 = vpop.f32.mrf.mxu0 }
  0xd3   :  { %v199_v15 = vpop.f32.mrf.mxu1 }
  0xd4   :  { %v284_v16 = vpop.f32.mrf.mxu0  ;;  %v203_v18 = vmax.f32 %v199_v15, 1e-24 }
  0xd5   :  { %v289_v17 = vpop.f32.mrf.mxu1 }
  0xd6   :  { %299 = vrsqrt.f32 %v203_v18 }
  0xe3   :  { %v300_v22 = vpop.eup %299 }
  0xe4   :  { %v215_v23 = vrot.slane %v300_v22, %v214_v21 }
 0x12f   :  { %v209_v24 = vpop.permute.xlu0 %208 }
 0x130   :  { %v211_v25 = vmul.f32 %v209_v24, %v122_v14 }
 0x132   :  { %v216_v26 = vmul.f32 %v215_v23, %v211_v25 }
 0x134   :  { %v217_v27 = vmul.f32 1.442695, %v216_v26  ;;  %v239_v35 = vsel %vm228_vm3, %v216_v26, 0.0 }
 0x135   :  { %v240_v36 = vsel %vm231_vm4, %v239_v35, 0.0 }
 0x136   :  { %301 = vpow2.f32 %v217_v27 }
 0x143   :  { %v302_v30 = vpop.eup %301 }
 0x144   :  { %v230_v31 = vsel %vm228_vm3, 0.0, %v302_v30 }
 0x145   :  { %v232_v32 = vsel %vm231_vm4, %v230_v31, 0.0 }
 0x146   :  { %233 = vadd.xlane.f32.xlu1 %v232_v32 }
 0x14a   :  { %249 = vadd.xlane.f32.xlu1 %v248_v34 }
 0x14e   :  { %241 = vadd.xlane.f32.xlu1 %v240_v36 }
 0x1cf   :  { %v234_v38 = vpop.xlane.xlu1 %233 }
 0x1d0   :  { %v235_v39 = vadd.f32 %v234_v38, %v229_v37 }
 0x1d2   :  { %237 = vst.msk [vmem:[#allocation3] sm:$0xff] %vm42_vm1, %v235_v39 }
 0x1d3   :  { %v250_v41 = vpop.xlane.xlu1 %249 }
 0x1d4   :  { %v251_v42 = vadd.f32 %v250_v41, %v245_v40 }
 0x1d6   :  { %252 = vst.msk [vmem:[#allocation5] sm:$0xff] %vm42_vm1, %v251_v42 }
 0x1d7   :  { %v242_v44 = vpop.xlane.xlu1 %241 }
 0x1d8   :  { %v243_v45 = vadd.f32 %v242_v44, %v238_v43 }
 0x1d9   :  { %v256_v46 = vld [vmem:[#allocation3] sm:$0xff] }
 0x1da   :  { %303 = vlog2.f32 %v256_v46  ;;  %244 = vst.msk [vmem:[#allocation4] sm:$0xff] %vm42_vm1, %v243_v45 }
 0x1dd   :  { %v257_v49 = vld [vmem:[#allocation5] sm:$0xff] }
 0x1e1   :  { %v261_v51 = vld [vmem:[#allocation4] sm:$0xff] }
 0x1e7   :  { %v304_v47 = vpop.eup %303 }
 0x1e8   :  { %v259_v48 = vmul.f32 0.6931472, %v304_v47 }
 0x1ea   :  { %v260_v50 = vmul.f32 %v259_v48, %v257_v49 }
 0x1ec   :  { %v262_v52 = vsub.f32 %v260_v50, %v261_v51 }
 0x1ee   :  { %v263_v53 = vmul.f32 0.0625, %v262_v52 }
 0x1f0   :  { %264 = vst.msk [vmem:[%s384_s4] sm:$0xff] %vm42_vm1, %v263_v53 }
 0x1f1   :  { %269 = vsyncpa [#allocation7], 1 }

</bundles_post_ra>
